<compile_context>
chip_gen: v5e
topology: v5e:2x2
jax: 0.10.0
libtpu: 0.0.40
codegen_flags: <defaults>
</compile_context>

<pallas_src>
import jax
import jax.numpy as jnp
from jax import lax
from jax.experimental import pallas as pl
from jax.experimental.pallas import tpu as pltpu


def _round_up(x, m):
    return ((x + m - 1) // m) * m


def _linear_kernel(x_ref, w_ref, b_ref, o_ref, acc_ref):
    # x_ref: (tm, tk), w_ref: (tn, tk), b_ref: (1, tn), o_ref: (tm, tn)
    k = pl.program_id(2)

    @pl.when(k == 0)
    def _init():
        acc_ref[...] = jnp.zeros_like(acc_ref)

    # x @ w.T without materializing a transpose: contract last dims of both.
    acc_ref[...] += lax.dot_general(
        x_ref[...],
        w_ref[...],
        dimension_numbers=(((1,), (1,)), ((), ())),
        preferred_element_type=jnp.float32,
    )

    @pl.when(k == pl.num_programs(2) - 1)
    def _epilogue():
        o_ref[...] = (acc_ref[...] + b_ref[...].astype(jnp.float32)).astype(
            o_ref.dtype
        )


def stateless_linear(weight, x, bias=None, *, tm_max=256, tn_max=512, tk_max=512):
    """y = x @ weight.T + bias.  x: (..., K), weight: (N, K), bias: (N,)."""
    out_features, in_features = weight.shape
    assert x.shape[-1] == in_features
    if bias is None:
        bias = jnp.zeros((out_features,), x.dtype)

    lead_shape = x.shape[:-1]
    x2d = x.reshape(-1, in_features)
    M, K = x2d.shape
    N = out_features

    # Lane-dense output: pad N to a multiple of 128. Pads weight/bias once in
    # HBM (cheap, amortized over all grid steps); never pads the activations.
    Np = _round_up(N, 128)
    if Np != N:
        weight = jnp.pad(weight, ((0, Np - N), (0, 0)))
        bias = jnp.pad(bias, ((0, Np - N),))
    bias2d = bias.reshape(1, Np)

    # K is the contraction dim, so its tiling must cover it exactly (OOB reads
    # would corrupt real outputs). Pick a divisor tile, else use the full K.
    tk = K
    for cand in (tk_max, 256, 128):
        if K >= cand and K % cand == 0:
            tk = cand
            break
    # TODO(synk): for very large K that is not a multiple of 128, zero-pad K
    # instead of falling back to a full-K tile, to keep tiles VMEM-bounded.

    # M needs no padding: block row-count just has to be a multiple of 8; the
    # ragged last M block is handled by Pallas' masked boundary stores.
    tm = min(tm_max, _round_up(M, 8))
    tn = min(tn_max, Np)  # multiple of 128 since Np is

    grid = (pl.cdiv(M, tm), pl.cdiv(Np, tn), pl.cdiv(K, tk))

    out = pl.pallas_call(
        _linear_kernel,
        out_shape=jax.ShapeDtypeStruct((M, Np), x.dtype),
        grid_spec=pltpu.PrefetchScalarGridSpec(
            num_scalar_prefetch=0,
            grid=grid,
            in_specs=[
                pl.BlockSpec((tm, tk), lambda i, j, k: (i, k)),   # x
                pl.BlockSpec((tn, tk), lambda i, j, k: (j, k)),   # weight (N, K)
                pl.BlockSpec((1, tn), lambda i, j, k: (0, j)),    # bias
            ],
            out_specs=pl.BlockSpec((tm, tn), lambda i, j, k: (i, j)),
            scratch_shapes=[pltpu.VMEM((tm, tn), jnp.float32)],
        ),
        compiler_params=pltpu.CompilerParams(
            dimension_semantics=("parallel", "parallel", "arbitrary"),
            vmem_limit_bytes=64 * 1024 * 1024,
        ),
    )(x2d, weight, bias2d)

    if Np != N:
        out = out[:, :N]
    return out.reshape(*lead_shape, N)


if __name__ == "__main__":
    # Small shapes implied by the module: a linear over the last axis.
    batch, seq = 2, 8
    in_features, out_features = 32, 48

    key = jax.random.PRNGKey(0)
    k_w, k_b, k_x = jax.random.split(key, 3)

    # Deterministic synthetic parameters (no checkpoint load).
    weight = jax.random.normal(k_w, (out_features, in_features), jnp.float32) * 0.05
    bias = jax.random.normal(k_b, (out_features,), jnp.float32) * 0.05
    x = jax.random.normal(k_x, (batch, seq, in_features), jnp.float32)

    y = stateless_linear(weight, x, bias)
    y = jax.block_until_ready(y)

    # Reference check against plain JAX (F.linear semantics). Tolerance allows
    # for the MXU's default f32-via-bf16 matmul passes.
    y_ref = x @ weight.T + bias
    assert y.shape == (batch, seq, out_features)
    assert jnp.allclose(y, y_ref, atol=1e-3, rtol=1e-3), float(
        jnp.max(jnp.abs(y - y_ref))
    )

    print("KERNEL_OK")
</pallas_src>

<mosaic_0001>
module attributes {stable_mosaic.version = 11 : i64} {
  func.func @_linear_kernel(%arg0: i32, %arg1: i32, %arg2: i32, %arg3: memref<16x32xf32, #tpu.memory_space<vmem>>, %arg4: memref<128x32xf32, #tpu.memory_space<vmem>>, %arg5: memref<1x128xf32, #tpu.memory_space<vmem>>, %arg6: memref<16x128xf32, #tpu.memory_space<vmem>>, %arg7: memref<16x128xf32, #tpu.memory_space<vmem>>) attributes {dimension_semantics = [#tpu.dimension_semantics<parallel>, #tpu.dimension_semantics<parallel>, #tpu.dimension_semantics<arbitrary>], iteration_bounds = array<i64: 1, 1, 1>, scalar_prefetch = 0 : i64, scratch_operands = 1 : i64, tpu.core_type = #tpu.core_type<tc>, window_params = [{transform_indices = @transform_0, window_bounds = array<i64: 16, 32>}, {transform_indices = @transform_1, window_bounds = array<i64: 128, 32>}, {transform_indices = @transform_2, window_bounds = array<i64: 1, 128>}, {transform_indices = @transform_3, window_bounds = array<i64: 16, 128>}]} {
    %c0_i32 = arith.constant 0 : i32
    %0 = arith.cmpi eq, %arg2, %c0_i32 : i32
    %1 = arith.extui %0 : i1 to i32
    %c0_i32_0 = arith.constant 0 : i32
    %2 = arith.cmpi ne, %1, %c0_i32_0 : i32
    scf.if %2 {
      %cst_10 = arith.constant 0.000000e+00 : f32
      %12 = vector.broadcast %cst_10 : f32 to vector<16x128xf32>
      %c0_11 = arith.constant 0 : index
      %c0_12 = arith.constant 0 : index
      %13 = vector.load %arg7[%c0_11, %c0_12] : memref<16x128xf32, #tpu.memory_space<vmem>>, vector<16x128xf32>
      tpu.vector_store %arg7[%c0_11, %c0_12], %12 {strides = array<i32>} : memref<16x128xf32, #tpu.memory_space<vmem>>, vector<16x128xf32>,
    } else {
    }
    %c0 = arith.constant 0 : index
    %c0_1 = arith.constant 0 : index
    %3 = vector.load %arg7[%c0, %c0_1] : memref<16x128xf32, #tpu.memory_space<vmem>>, vector<16x128xf32>
    %c0_2 = arith.constant 0 : index
    %c0_3 = arith.constant 0 : index
    %4 = vector.load %arg3[%c0_2, %c0_3] : memref<16x32xf32, #tpu.memory_space<vmem>>, vector<16x32xf32>
    %c0_4 = arith.constant 0 : index
    %c0_5 = arith.constant 0 : index
    %5 = vector.load %arg4[%c0_4, %c0_5] : memref<128x32xf32, #tpu.memory_space<vmem>>, vector<128x32xf32>
    %cst = arith.constant dense<0.000000e+00> : vector<16x128xf32>
    %6 = tpu.matmul %4, %5, %cst {dimension_numbers = #tpu.dot_dimension_numbers<[1], [1], [0], [0], [0, 0, 1, 0], [], []>} : vector<16x32xf32>, vector<128x32xf32>, vector<16x128xf32> -> vector<16x128xf32>
    %7 = arith.addf %3, %6 : vector<16x128xf32>
    %c0_6 = arith.constant 0 : index
    %c0_7 = arith.constant 0 : index
    %8 = vector.load %arg7[%c0_6, %c0_7] : memref<16x128xf32, #tpu.memory_space<vmem>>, vector<16x128xf32>
    tpu.vector_store %arg7[%c0_6, %c0_7], %7 {strides = array<i32>} : memref<16x128xf32, #tpu.memory_space<vmem>>, vector<16x128xf32>,
    %c0_i32_8 = arith.constant 0 : i32
    %9 = arith.cmpi eq, %arg2, %c0_i32_8 : i32
    %10 = arith.extui %9 : i1 to i32
    %c0_i32_9 = arith.constant 0 : i32
    %11 = arith.cmpi ne, %10, %c0_i32_9 : i32
    scf.if %11 {
      %c0_10 = arith.constant 0 : index
      %c0_11 = arith.constant 0 : index
      %12 = vector.load %arg7[%c0_10, %c0_11] : memref<16x128xf32, #tpu.memory_space<vmem>>, vector<16x128xf32>
      %c0_12 = arith.constant 0 : index
      %c0_13 = arith.constant 0 : index
      %13 = vector.load %arg5[%c0_12, %c0_13] : memref<1x128xf32, #tpu.memory_space<vmem>>, vector<1x128xf32>
      %14 = vector.broadcast %13 : vector<1x128xf32> to vector<16x128xf32>
      %15 = arith.addf %12, %14 : vector<16x128xf32>
      %c0_14 = arith.constant 0 : index
      %c0_15 = arith.constant 0 : index
      %16 = vector.load %arg6[%c0_14, %c0_15] : memref<16x128xf32, #tpu.memory_space<vmem>>, vector<16x128xf32>
      tpu.vector_store %arg6[%c0_14, %c0_15], %15 {strides = array<i32>} : memref<16x128xf32, #tpu.memory_space<vmem>>, vector<16x128xf32>,
    } else {
    }
    return
  }
  func.func @transform_0(%arg0: i32, %arg1: i32, %arg2: i32) -> (i32, i32) {
    %c0_i32 = arith.constant 0 : i32
    return %arg0, %arg2 : i32, i32
  }
  func.func @transform_1(%arg0: i32, %arg1: i32, %arg2: i32) -> (i32, i32) {
    %c0_i32 = arith.constant 0 : i32
    return %arg1, %arg2 : i32, i32
  }
  func.func @transform_2(%arg0: i32, %arg1: i32, %arg2: i32) -> (i32, i32) {
    %c0_i32 = arith.constant 0 : i32
    %c0_i32_0 = arith.constant 0 : i32
    return %c0_i32, %arg1 : i32, i32
  }
  func.func @transform_3(%arg0: i32, %arg1: i32, %arg2: i32) -> (i32, i32) {
    %c0_i32 = arith.constant 0 : i32
    return %arg0, %arg1 : i32, i32
  }
}

</mosaic_0001>

<bundles_post_ra>
// kernel: tpu_custom_call.1
= control target key start
LH: loop header
LB: loop body
LE: loop exit
PB: predicated region body
PF: predicated region fallthrough
CT: control target
= control target key end

     0   :  { %vm41_vm0 = vcmask 261120   ;;  %s335_s0 = inlined_call_operand.vmem [shape: f32[16,32], index: 0, kind: input, shape index: {}]   ;;  %s336_s1 = inlined_call_operand.vmem [shape: f32[128,32], index: 1, kind: input, shape index: {}]   ;;  %s337_s2 = inlined_call_operand.vmem [shape: f32[1,128], index: 2, kind: input, shape index: {}]   ;;  %s338_s3 = inlined_call_operand.hbm [shape: f32[16,128], index: 3, kind: output, shape index: {}]  }
   0x1   :  { %v40_v0 = vld [vmem:[%s336_s1 + $0x78] sm:$0xff]  ;;  %v39_v1 = vld [vmem:[%s336_s1 + $0x70] sm:$0xff] }
   0x2   :  { %154 = vmatpush.xpose.msk.msra.mxu0 %vm41_vm0, %v40_v0  ;;  %172 = vmatpush.xpose.msk.msra.mxu1 %vm41_vm0, %v40_v0 }
   0x3   :  { %8 = vsyncpa [#allocation4], 0  ;;  %v38_v2 = vld [vmem:[%s336_s1 + $0x68] sm:$0xff]  ;;  %v37_v3 = vld [vmem:[%s336_s1 + $0x60] sm:$0xff]  ;;  %s142_s26 = sshll.u32 %s338_s3, 4  ;;  %s220_s27 = smov 8   ;;  %s143_s26 = int_to_ptr.hbm [resolvable:$true] %s142_s26 }
   0x4   :  { %v36_v4 = vld [vmem:[%s336_s1 + $0x58] sm:$0xff]  ;;  %v35_v5 = vld [vmem:[%s336_s1 + $0x50] sm:$0xff]  ;;  %v34_v6 = vld [vmem:[%s336_s1 + $0x48] sm:$0xff] }
   0x5   :  { %v33_v7 = vld [vmem:[%s336_s1 + $0x40] sm:$0xff]  ;;  %v32_v8 = vld [vmem:[%s336_s1 + $0x38] sm:$0xff]  ;;  %v31_v9 = vld [vmem:[%s336_s1 + $0x30] sm:$0xff] }
   0x6   :  { %155 = vmatpush.xpose.msk.msra.mxu0 %vm41_vm0, %v39_v1  ;;  %173 = vmatpush.xpose.msk.msra.mxu1 %vm41_vm0, %v39_v1  ;;  %v30_v10 = vld [vmem:[%s336_s1 + $0x28] sm:$0xff]  ;;  %v29_v11 = vld [vmem:[%s336_s1 + $0x20] sm:$0xff]  ;;  %v28_v12 = vld [vmem:[%s336_s1 + $0x18] sm:$0xff] }
   0x7   :  { %v27_v13 = vld [vmem:[%s336_s1 + $0x10] sm:$0xff]  ;;  %v26_v14 = vld [vmem:[%s336_s1 + $0x8] sm:$0xff]  ;;  %v25_v15 = vld [vmem:[%s336_s1] sm:$0xff]  ;;  %s218_s1 = smov [#allocation3]  }
   0x8   :  { %v23_v16 = vld [vmem:[%s335_s0] sm:$0xff]  ;;  %v24_v17 = vld [vmem:[%s335_s0 + $0x8] sm:$0xff]  ;;  %s140_s23 = sshll.u32 %s218_s1, 4  ;;  %s219_s0 = smov 128   ;;  %s141_s23 = int_to_ptr.vmem [resolvable:$true] %s140_s23 }
   0x9   :  { %v191_v18 = vld [vmem:[%s337_s2] ss:$0 sm:$0xff] }
   0xa   :  { %156 = vmatpush.xpose.msk.msra.mxu0 %vm41_vm0, %v38_v2  ;;  %174 = vmatpush.xpose.msk.msra.mxu1 %vm41_vm0, %v38_v2 }
   0xe   :  { %157 = vmatpush.xpose.msk.msra.mxu0 %vm41_vm0, %v37_v3  ;;  %175 = vmatpush.xpose.msk.msra.mxu1 %vm41_vm0, %v37_v3 }
  0x12   :  { %158 = vmatpush.xpose.msk.msra.mxu0 %vm41_vm0, %v36_v4  ;;  %176 = vmatpush.xpose.msk.msra.mxu1 %vm41_vm0, %v36_v4 }
  0x16   :  { %159 = vmatpush.xpose.msk.msra.mxu0 %vm41_vm0, %v35_v5  ;;  %177 = vmatpush.xpose.msk.msra.mxu1 %vm41_vm0, %v35_v5 }
  0x1a   :  { %160 = vmatpush.xpose.msk.msra.mxu0 %vm41_vm0, %v34_v6  ;;  %178 = vmatpush.xpose.msk.msra.mxu1 %vm41_vm0, %v34_v6 }
  0x1e   :  { %161 = vmatpush.xpose.msk.msra.mxu0 %vm41_vm0, %v33_v7  ;;  %179 = vmatpush.xpose.msk.msra.mxu1 %vm41_vm0, %v33_v7 }
  0x22   :  { %162 = vmatpush.xpose.msk.msra.mxu0 %vm41_vm0, %v32_v8  ;;  %180 = vmatpush.xpose.msk.msra.mxu1 %vm41_vm0, %v32_v8 }
  0x26   :  { %163 = vmatpush.xpose.msk.msra.mxu0 %vm41_vm0, %v31_v9  ;;  %181 = vmatpush.xpose.msk.msra.mxu1 %vm41_vm0, %v31_v9 }
  0x2a   :  { %164 = vmatpush.xpose.msk.msra.mxu0 %vm41_vm0, %v30_v10  ;;  %182 = vmatpush.xpose.msk.msra.mxu1 %vm41_vm0, %v30_v10 }
  0x2e   :  { %165 = vmatpush.xpose.msk.msra.mxu0 %vm41_vm0, %v29_v11  ;;  %183 = vmatpush.xpose.msk.msra.mxu1 %vm41_vm0, %v29_v11 }
  0x32   :  { %166 = vmatpush.xpose.msk.msra.mxu0 %vm41_vm0, %v28_v12  ;;  %184 = vmatpush.xpose.msk.msra.mxu1 %vm41_vm0, %v28_v12 }
  0x36   :  { %167 = vmatpush.xpose.msk.msra.mxu0 %vm41_vm0, %v27_v13  ;;  %185 = vmatpush.xpose.msk.msra.mxu1 %vm41_vm0, %v27_v13 }
  0x3a   :  { %168 = vmatpush.xpose.msk.msra.mxu0 %vm41_vm0, %v26_v14  ;;  %186 = vmatpush.xpose.msk.msra.mxu1 %vm41_vm0, %v26_v14 }
  0x3e   :  { %169 = vmatpush.xpose.msk.msra.mxu0 %vm41_vm0, %v25_v15  ;;  %187 = vmatpush.xpose.msk.msra.mxu1 %vm41_vm0, %v25_v15 }
  0x41   :  { %170 = vmatmul.msk.f32.vlgmr.msra.gmra.mxu0 %vm41_vm0, %v23_v16  ;;  %171 = vmatmul.msk.f32.vlgmr.msra.gmra.mxu1 %vm41_vm0, %v24_v17 }
  0xbe   :  { %v113_v19 = vpop.f32.mrf.mxu0  ;;  %v116_v20 = vpop.f32.mrf.mxu1 }
  0xbf   :  { %v132_v21 = vadd.f32 %v191_v18, %v113_v19  ;;  %v133_v22 = vadd.f32 %v191_v18, %v116_v20 }
  0xc1   :  { %134 = vst [vmem:[#allocation3] sm:$0xff] %v132_v21 }
  0xc2   :  { %135 = vst [vmem:[#allocation3 + $0x8] sm:$0xff] %v133_v22 }
  0xc3   :  { %148 = dma.vmem_to_hbm [thread:$0]  %s141_s23, 256, %s143_s26, [#allocation4], %s219_s0, %s219_s0, %s220_s27  }
  0xc4   :  { %216 = dma.done.wait [#allocation4], 256  }
  0xc5   :  { %217 = vsyncadd [#allocation4], 4294967040 }
  0xc6   :  { %153 = vsyncpa [#allocation4], 1 }

</bundles_post_ra>
